<compile_context>
chip_gen: v5e
topology: v5e:2x2
jax: 0.10.0
libtpu: 0.0.40
codegen_flags: <defaults>
</compile_context>

<pallas_src>
import functools

import jax
import jax.numpy as jnp
from jax.experimental import pallas as pl
from jax.experimental.pallas import tpu as pltpu

LANE = 128
_VMEM_BUDGET = 40 * 1024 * 1024   # conservative per-step budget (v7x has 64 MiB)


def _round_up(x, m):
    return (x + m - 1) // m * m


def _clamp_vmem(nbytes):
    # A limit, not an allocation: floor generously, cap at v7x physical VMEM.
    return int(min(64 * 1024 * 1024, max(32 * 1024 * 1024, nbytes)))


# ---------------------------------------------------------------------------
# Packed path: all K^3 taps folded into the contraction dim (small Cin).
# ---------------------------------------------------------------------------
def _packed_conv_bn_stats_kernel(x_ref, w_ref, y_ref, psum_ref, psumsq_ref):
    """One (batch n, output depth d, H-tile h) grid step.

    x_ref:      (1, 1, TH, W_out, CK_p)    bf16 im2col'd input (all taps packed)
    w_ref:      (CK_p, Cout_p)             bf16 packed weight (resident, 1-buffered)
    y_ref:      (1, 1, TH, W_out, Cout_p)  bf16 conv output block
    psum_ref:   (1, 1, Cout_p)             f32 per-batch partial channel sum
    psumsq_ref: (1, 1, Cout_p)             f32 per-batch partial channel sum-of-squares
    """
    d = pl.program_id(1)
    h = pl.program_id(2)
    _, _, th, w_out, ck_p = x_ref.shape

    @pl.when(jnp.logical_and(d == 0, h == 0))
    def _():
        psum_ref[...] = jnp.zeros_like(psum_ref)
        psumsq_ref[...] = jnp.zeros_like(psumsq_ref)

    # Single MXU contraction per step: the whole 3x3x3 stencil lives in the
    # packed contraction dim (>=128), so there is no accumulator RMW and the
    # result is popped from the MXU exactly once.  The flatten below merges
    # major dims of an exactly-output-shaped block (tile-congruent / free when
    # W_out is a multiple of 8).
    x2 = x_ref[...].reshape(th * w_out, ck_p)
    acc = jnp.dot(x2, w_ref[...], preferred_element_type=jnp.float32)

    y_ref[...] = acc.astype(y_ref.dtype).reshape(y_ref.shape)
    psum_ref[...] += jnp.sum(acc, axis=0).reshape(psum_ref.shape)
    psumsq_ref[...] += jnp.sum(acc * acc, axis=0).reshape(psumsq_ref.shape)


def _conv3d_packed(x_ncdhw, weight, *, padding):
    N, C_in, D, H, W = x_ncdhw.shape
    C_out, _, K, _, _ = weight.shape
    D_out = D + 2 * padding - K + 1
    H_out = H + 2 * padding - K + 1
    W_out = W + 2 * padding - K + 1

    CK = K * K * K * C_in
    CK_p = _round_up(CK, LANE)
    C_out_p = _round_up(C_out, LANE)

    # NCDHW -> NDHWC, bf16, halo pad (no channel pad needed before packing).
    x = jnp.transpose(x_ncdhw, (0, 2, 3, 4, 1)).astype(jnp.bfloat16)
    x_pad = jnp.pad(x, ((0, 0), (padding, padding), (padding, padding),
                        (padding, padding), (0, 0)))

    # im2col: pack all K^3 stencil taps into the contraction (lane) dim.
    taps = []
    for kd in range(K):
        for kh in range(K):
            for kw in range(K):
                taps.append(x_pad[:, kd:kd + D_out, kh:kh + H_out,
                                  kw:kw + W_out, :])
    x_packed = jnp.concatenate(taps, axis=-1)                 # (..., K^3*Cin)
    x_packed = jnp.pad(x_packed, ((0, 0),) * 4 + ((0, CK_p - CK),))

    # (Cout, Cin, kD, kH, kW) -> (K^3*Cin, Cout), padded, bf16.  Row order
    # matches the concat order above: ((kd*K + kh)*K + kw)*Cin + ci.
    w = jnp.transpose(weight, (2, 3, 4, 1, 0)).reshape(CK, C_out)
    w = jnp.pad(w, ((0, CK_p - CK), (0, C_out_p - C_out))).astype(jnp.bfloat16)

    # Spatial H tile: largest divisor of H_out whose per-step blocks fit the
    # VMEM budget; vmem_limit_bytes derived from the actual block sizes.
    def blocks_bytes(th):
        return (2 * th * W_out * CK_p * 2          # input block, double-buffered
                + 2 * th * W_out * C_out_p * 2     # bf16 y block, double-buffered
                + CK_p * C_out_p * 2               # resident weight (1 buffer)
                + 4 * 2 * C_out_p * 4)             # stats blocks

    TH = H_out
    for th in range(H_out, 0, -1):
        if H_out % th == 0 and blocks_bytes(th) <= _VMEM_BUDGET:
            TH = th
            break
    vmem_limit = _clamp_vmem(blocks_bytes(TH) + (2 << 20))

    y, psum, psumsq = pl.pallas_call(
        _packed_conv_bn_stats_kernel,
        grid=(N, D_out, H_out // TH),
        in_specs=[
            pl.BlockSpec((1, 1, TH, W_out, CK_p),
                         lambda n, d, h: (n, d, h, 0, 0)),
            # Constant-index weight: DMA'd once, kept resident, single-buffered.
            pl.BlockSpec((CK_p, C_out_p), lambda n, d, h: (0, 0),
                         pipeline_mode=pl.Buffered(1)),
        ],
        out_specs=[
            pl.BlockSpec((1, 1, TH, W_out, C_out_p),
                         lambda n, d, h: (n, d, h, 0, 0)),
            pl.BlockSpec((1, 1, C_out_p), lambda n, d, h: (n, 0, 0)),
            pl.BlockSpec((1, 1, C_out_p), lambda n, d, h: (n, 0, 0)),
        ],
        out_shape=(
            jax.ShapeDtypeStruct((N, D_out, H_out, W_out, C_out_p), jnp.bfloat16),
            jax.ShapeDtypeStruct((N, 1, C_out_p), jnp.float32),
            jax.ShapeDtypeStruct((N, 1, C_out_p), jnp.float32),
        ),
        compiler_params=pltpu.CompilerParams(
            dimension_semantics=("parallel", "arbitrary", "arbitrary"),
            vmem_limit_bytes=vmem_limit,
        ),
    )(x_packed, w)
    return y, psum, psumsq


# ---------------------------------------------------------------------------
# General path: channels on the contraction, depth tap kd folded into the grid.
# ---------------------------------------------------------------------------
def _general_conv_bn_stats_kernel(x_ref, w_ref, y_ref, psum_ref, psumsq_ref,
                                  acc_ref, *, K, H_out, W_out):
    """One (batch n, output depth d, depth tap kd) grid step.

    x_ref:      (1, 1, H_pad, W_pad, Cin_p)   bf16 padded input depth slice d+kd
    w_ref:      (K*K*K, Cin_p, Cout_p)        bf16 full weight (resident, 1-buffered)
    y_ref:      (1, 1, H_out, W_out, Cout_p)  bf16 conv output block (revisited over kd)
    psum_ref:   (1, 1, Cout_p)                f32 per-batch partial channel sum
    psumsq_ref: (1, 1, Cout_p)                f32 per-batch partial channel sum-of-squares
    acc_ref:    (H_out*W_out, Cout_p)         f32 VMEM scratch accumulator
    """
    d = pl.program_id(1)
    kd = pl.program_id(2)
    cin_p = x_ref.shape[-1]
    cout_p = acc_ref.shape[-1]

    @pl.when(jnp.logical_and(d == 0, kd == 0))
    def _():
        psum_ref[...] = jnp.zeros_like(psum_ref)
        psumsq_ref[...] = jnp.zeros_like(psumsq_ref)

    # K*K MXU matmuls for this depth tap, accumulated in live values and
    # committed to the VMEM accumulator exactly once per grid step (review:
    # avoid 9 full accumulator read-modify-writes hammering the vst slot).
    contrib = None
    for kh in range(K):
        for kw in range(K):
            xs = x_ref[0, 0, kh:kh + H_out, kw:kw + W_out, :]
            xs = xs.reshape(H_out * W_out, cin_p)
            wk = w_ref[kd * (K * K) + kh * K + kw]          # (Cin_p, Cout_p)
            p = jnp.dot(xs, wk, preferred_element_type=jnp.float32)
            contrib = p if contrib is None else contrib + p

    @pl.when(kd == 0)
    def _():
        acc_ref[...] = contrib

    @pl.when(kd > 0)
    def _():
        acc_ref[...] += contrib

    # Last depth tap: emit the lane-dense bf16 conv block + per-batch partials.
    @pl.when(kd == K - 1)
    def _():
        acc = acc_ref[...]
        y_ref[...] = acc.astype(y_ref.dtype).reshape(y_ref.shape)
        psum_ref[...] += jnp.sum(acc, axis=0).reshape(psum_ref.shape)
        psumsq_ref[...] += jnp.sum(acc * acc, axis=0).reshape(psumsq_ref.shape)


def _conv3d_general(x_ncdhw, weight, *, padding):
    N, C_in, D, H, W = x_ncdhw.shape
    C_out, _, K, _, _ = weight.shape
    D_out = D + 2 * padding - K + 1
    H_out = H + 2 * padding - K + 1
    W_out = W + 2 * padding - K + 1

    C_in_p = _round_up(C_in, LANE)
    C_out_p = _round_up(C_out, LANE)

    x = jnp.transpose(x_ncdhw, (0, 2, 3, 4, 1)).astype(jnp.bfloat16)
    x_pad = jnp.pad(x, ((0, 0), (padding, padding), (padding, padding),
                        (padding, padding), (0, C_in_p - C_in)))
    H_pad, W_pad = x_pad.shape[2:4]

    w = jnp.transpose(weight, (2, 3, 4, 1, 0)).astype(jnp.bfloat16)
    w = jnp.pad(w, ((0, 0), (0, 0), (0, 0),
                    (0, C_in_p - C_in), (0, C_out_p - C_out)))
    w_flat = w.reshape(K * K * K, C_in_p, C_out_p)

    # VMEM limit computed from the actual block sizes (no hard-coded 48 MiB).
    need = (2 * H_pad * W_pad * C_in_p * 2          # input block, double-buffered
            + 2 * H_out * W_out * C_out_p * 2       # bf16 y block, double-buffered
            + H_out * W_out * C_out_p * 4           # f32 accumulator scratch
            + K * K * K * C_in_p * C_out_p * 2      # resident weight (1 buffer)
            + 4 * 2 * C_out_p * 4)                  # stats blocks
    vmem_limit = _clamp_vmem(need + (2 << 20))
    # TODO(synk): tile H_out / C_out here for realistic shapes where these
    # blocks would exceed v7x's 64 MiB VMEM; not needed at the test sizes.

    kernel = functools.partial(_general_conv_bn_stats_kernel, K=K,
                               H_out=H_out, W_out=W_out)

    y, psum, psumsq = pl.pallas_call(
        kernel,
        grid=(N, D_out, K),
        in_specs=[
            pl.BlockSpec((1, 1, H_pad, W_pad, C_in_p),
                         lambda n, d, kd: (n, d + kd, 0, 0, 0)),
            pl.BlockSpec((K * K * K, C_in_p, C_out_p),
                         lambda n, d, kd: (0, 0, 0),
                         pipeline_mode=pl.Buffered(1)),
        ],
        out_specs=[
            pl.BlockSpec((1, 1, H_out, W_out, C_out_p),
                         lambda n, d, kd: (n, d, 0, 0, 0)),
            pl.BlockSpec((1, 1, C_out_p), lambda n, d, kd: (n, 0, 0)),
            pl.BlockSpec((1, 1, C_out_p), lambda n, d, kd: (n, 0, 0)),
        ],
        out_shape=(
            jax.ShapeDtypeStruct((N, D_out, H_out, W_out, C_out_p), jnp.bfloat16),
            jax.ShapeDtypeStruct((N, 1, C_out_p), jnp.float32),
            jax.ShapeDtypeStruct((N, 1, C_out_p), jnp.float32),
        ),
        scratch_shapes=[pltpu.VMEM((H_out * W_out, C_out_p), jnp.float32)],
        compiler_params=pltpu.CompilerParams(
            dimension_semantics=("parallel", "arbitrary", "arbitrary"),
            vmem_limit_bytes=vmem_limit,
        ),
    )(x_pad, w_flat)
    return y, psum, psumsq


# ---------------------------------------------------------------------------
# Public wrapper: conv (Pallas) + training-mode BatchNorm3d epilogue (fused XLA).
# ---------------------------------------------------------------------------
def conv3d_bn(x_ncdhw, weight, gamma, beta, *, stride=1, padding=1, eps=1e-5):
    assert stride == 1, "kernel implements the module defaults (stride=1)"
    N, C_in, D, H, W = x_ncdhw.shape
    C_out, C_in_w, Kd, Kh, Kw = weight.shape
    assert C_in_w == C_in and Kd == Kh == Kw
    K = Kd
    D_out = D + 2 * padding - K + 1
    H_out = H + 2 * padding - K + 1
    W_out = W + 2 * padding - K + 1

    # Packed-contraction path when the whole stencil fits a dense 128/256-deep
    # contraction (small-Cin stem layers); channel-contraction path otherwise.
    if _round_up(K * K * K * C_in, LANE) <= 2 * LANE:
        y, psum, psumsq = _conv3d_packed(x_ncdhw, weight, padding=padding)
    else:
        y, psum, psumsq = _conv3d_general(x_ncdhw, weight, padding=padding)

    # BatchNorm3d, training-mode batch statistics (biased variance), from the
    # f32 per-batch partial sums the kernels produced.  NOTE: E[x^2]-E[x]^2 in
    # f32 with a >=0 clamp; fine for roughly zero-mean conv outputs.
    count = float(N * D_out * H_out * W_out)
    ch_sum = jnp.sum(psum[:, 0, :C_out], axis=0)
    ch_sumsq = jnp.sum(psumsq[:, 0, :C_out], axis=0)
    mean = ch_sum / count
    var = jnp.maximum(ch_sumsq / count - mean * mean, 0.0)
    inv = jax.lax.rsqrt(var + eps)
    scale = gamma.astype(jnp.float32) * inv
    shift = beta.astype(jnp.float32) - mean * scale
    # bf16 y is upcast, normalized, channel-unpadded and transposed back in one
    # fused XLA elementwise pass (no second full-volume Pallas pass needed).
    out_ndhwc = y[..., :C_out].astype(jnp.float32) * scale + shift
    return jnp.transpose(out_ndhwc, (0, 4, 1, 2, 3))


def _reference(x_ncdhw, weight, gamma, beta, eps=1e-5):
    """Plain-JAX f32 reference: lax conv + training-mode BatchNorm3d."""
    y = jax.lax.conv_general_dilated(
        x_ncdhw.astype(jnp.float32), weight.astype(jnp.float32),
        window_strides=(1, 1, 1),
        padding=((1, 1), (1, 1), (1, 1)),
        dimension_numbers=("NCDHW", "OIDHW", "NCDHW"))
    mean = y.mean(axis=(0, 2, 3, 4), keepdims=True)
    var = y.var(axis=(0, 2, 3, 4), keepdims=True)   # biased, as in BN training
    g = gamma.reshape(1, -1, 1, 1, 1)
    b = beta.reshape(1, -1, 1, 1, 1)
    return g * (y - mean) * jax.lax.rsqrt(var + eps) + b


if __name__ == "__main__":
    key = jax.random.PRNGKey(0)

    def run_case(case_key, N, C_in, C_out, D, H, W, K=3):
        kx, kw = jax.random.split(case_key)
        x = jax.random.normal(kx, (N, C_in, D, H, W), dtype=jnp.float32)
        weight = 0.1 * jax.random.normal(kw, (C_out, C_in, K, K, K),
                                         dtype=jnp.float32)
        gamma = jnp.ones((C_out,), dtype=jnp.float32)   # BatchNorm3d default init
        beta = jnp.zeros((C_out,), dtype=jnp.float32)
        out = jax.jit(conv3d_bn)(x, weight, gamma, beta)
        out = jax.block_until_ready(out)
        ref = _reference(x, weight, gamma, beta)
        assert out.shape == ref.shape, (out.shape, ref.shape)
        # bf16 MXU operands + bf16 conv output (f32 accumulation / stats) vs
        # f32 reference => relaxed tolerance.
        if not jnp.allclose(out, ref, rtol=5e-2, atol=5e-2):
            max_err = float(jnp.max(jnp.abs(out - ref)))
            raise AssertionError(f"mismatch vs reference, max abs err={max_err}")

    k1, k2 = jax.random.split(key)
    # Small-Cin (stem-style) config -> packed-contraction path.
    run_case(k1, N=2, C_in=4, C_out=8, D=4, H=8, W=8)
    # Larger-Cin config -> general (kd-in-grid) path.
    run_case(k2, N=2, C_in=16, C_out=8, D=4, H=8, W=8)

    print("KERNEL_OK")
</pallas_src>

<mosaic_0001>
module attributes {stable_mosaic.version = 11 : i64} {
  func.func @_packed_conv_bn_stats_kernel(%arg0: i32, %arg1: i32, %arg2: i32, %arg3: memref<1x1x8x8x128xbf16, #tpu.memory_space<vmem>>, %arg4: memref<128x128xbf16, #tpu.memory_space<vmem>>, %arg5: memref<1x1x8x8x128xbf16, #tpu.memory_space<vmem>>, %arg6: memref<1x1x128xf32, #tpu.memory_space<vmem>>, %arg7: memref<1x1x128xf32, #tpu.memory_space<vmem>>) attributes {dimension_semantics = [#tpu.dimension_semantics<parallel>, #tpu.dimension_semantics<arbitrary>, #tpu.dimension_semantics<arbitrary>], iteration_bounds = array<i64: 2, 4, 1>, scalar_prefetch = 0 : i64, scratch_operands = 0 : i64, tpu.core_type = #tpu.core_type<tc>, window_params = [{transform_indices = @transform_0, window_bounds = array<i64: 1, 1, 8, 8, 128>}, {pipeline_mode = #tpu.pipeline_mode<synchronous>, transform_indices = @transform_1, window_bounds = array<i64: 128, 128>}, {transform_indices = @transform_2, window_bounds = array<i64: 1, 1, 8, 8, 128>}, {transform_indices = @transform_3, window_bounds = array<i64: 1, 1, 128>}, {transform_indices = @transform_4, window_bounds = array<i64: 1, 1, 128>}]} {
    %c0_i32 = arith.constant 0 : i32
    %0 = arith.cmpi eq, %arg1, %c0_i32 : i32
    %c0_i32_0 = arith.constant 0 : i32
    %1 = arith.cmpi eq, %arg2, %c0_i32_0 : i32
    %2 = arith.andi %0, %1 : i1
    %3 = arith.extui %2 : i1 to i32
    %c0_i32_1 = arith.constant 0 : i32
    %4 = arith.cmpi ne, %3, %c0_i32_1 : i32
    scf.if %4 {
      %cst_27 = arith.constant 0.000000e+00 : f32
      %23 = vector.broadcast %cst_27 : f32 to vector<1x1x128xf32>
      %c0_28 = arith.constant 0 : index
      %c0_29 = arith.constant 0 : index
      %c0_30 = arith.constant 0 : index
      %24 = vector.load %arg6[%c0_28, %c0_29, %c0_30] : memref<1x1x128xf32, #tpu.memory_space<vmem>>, vector<1x1x128xf32>
      tpu.vector_store %arg6[%c0_28, %c0_29, %c0_30], %23 {strides = array<i32>} : memref<1x1x128xf32, #tpu.memory_space<vmem>>, vector<1x1x128xf32>,
      %cst_31 = arith.constant 0.000000e+00 : f32
      %25 = vector.broadcast %cst_31 : f32 to vector<1x1x128xf32>
      %c0_32 = arith.constant 0 : index
      %c0_33 = arith.constant 0 : index
      %c0_34 = arith.constant 0 : index
      %26 = vector.load %arg7[%c0_32, %c0_33, %c0_34] : memref<1x1x128xf32, #tpu.memory_space<vmem>>, vector<1x1x128xf32>
      tpu.vector_store %arg7[%c0_32, %c0_33, %c0_34], %25 {strides = array<i32>} : memref<1x1x128xf32, #tpu.memory_space<vmem>>, vector<1x1x128xf32>,
    } else {
    }
    %c0 = arith.constant 0 : index
    %c0_2 = arith.constant 0 : index
    %c0_3 = arith.constant 0 : index
    %c0_4 = arith.constant 0 : index
    %c0_5 = arith.constant 0 : index
    %5 = vector.load %arg3[%c0, %c0_2, %c0_3, %c0_4, %c0_5] : memref<1x1x8x8x128xbf16, #tpu.memory_space<vmem>>, vector<1x1x8x8x128xbf16>
    %6 = vector.shape_cast %5 : vector<1x1x8x8x128xbf16> to vector<64x128xbf16>
    %c0_6 = arith.constant 0 : index
    %c0_7 = arith.constant 0 : index
    %7 = vector.load %arg4[%c0_6, %c0_7] : memref<128x128xbf16, #tpu.memory_space<vmem>>, vector<128x128xbf16>
    %cst = arith.constant dense<0.000000e+00> : vector<64x128xf32>
    %8 = tpu.matmul %6, %7, %cst {dimension_numbers = #tpu.dot_dimension_numbers<[1], [0], [0], [1], [0, 0, 1, 1], [], []>} : vector<64x128xbf16>, vector<128x128xbf16>, vector<64x128xf32> -> vector<64x128xf32>
    %9 = arith.truncf %8 : vector<64x128xf32> to vector<64x128xbf16>
    %10 = vector.shape_cast %9 : vector<64x128xbf16> to vector<1x1x8x8x128xbf16>
    %c0_8 = arith.constant 0 : index
    %c0_9 = arith.constant 0 : index
    %c0_10 = arith.constant 0 : index
    %c0_11 = arith.constant 0 : index
    %c0_12 = arith.constant 0 : index
    %11 = vector.load %arg5[%c0_8, %c0_9, %c0_10, %c0_11, %c0_12] : memref<1x1x8x8x128xbf16, #tpu.memory_space<vmem>>, vector<1x1x8x8x128xbf16>
    tpu.vector_store %arg5[%c0_8, %c0_9, %c0_10, %c0_11, %c0_12], %10 {strides = array<i32>} : memref<1x1x8x8x128xbf16, #tpu.memory_space<vmem>>, vector<1x1x8x8x128xbf16>,
    %c0_13 = arith.constant 0 : index
    %c0_14 = arith.constant 0 : index
    %c0_15 = arith.constant 0 : index
    %12 = vector.load %arg6[%c0_13, %c0_14, %c0_15] : memref<1x1x128xf32, #tpu.memory_space<vmem>>, vector<1x1x128xf32>
    %cst_16 = arith.constant dense<0.000000e+00> : vector<128xf32>
    %13 = vector.multi_reduction <add>, %8, %cst_16 [0] : vector<64x128xf32> to vector<128xf32>
    %14 = vector.shape_cast %13 : vector<128xf32> to vector<1x1x128xf32>
    %15 = arith.addf %12, %14 : vector<1x1x128xf32>
    %c0_17 = arith.constant 0 : index
    %c0_18 = arith.constant 0 : index
    %c0_19 = arith.constant 0 : index
    %16 = vector.load %arg6[%c0_17, %c0_18, %c0_19] : memref<1x1x128xf32, #tpu.memory_space<vmem>>, vector<1x1x128xf32>
    tpu.vector_store %arg6[%c0_17, %c0_18, %c0_19], %15 {strides = array<i32>} : memref<1x1x128xf32, #tpu.memory_space<vmem>>, vector<1x1x128xf32>,
    %c0_20 = arith.constant 0 : index
    %c0_21 = arith.constant 0 : index
    %c0_22 = arith.constant 0 : index
    %17 = vector.load %arg7[%c0_20, %c0_21, %c0_22] : memref<1x1x128xf32, #tpu.memory_space<vmem>>, vector<1x1x128xf32>
    %18 = arith.mulf %8, %8 : vector<64x128xf32>
    %cst_23 = arith.constant dense<0.000000e+00> : vector<128xf32>
    %19 = vector.multi_reduction <add>, %18, %cst_23 [0] : vector<64x128xf32> to vector<128xf32>
    %20 = vector.shape_cast %19 : vector<128xf32> to vector<1x1x128xf32>
    %21 = arith.addf %17, %20 : vector<1x1x128xf32>
    %c0_24 = arith.constant 0 : index
    %c0_25 = arith.constant 0 : index
    %c0_26 = arith.constant 0 : index
    %22 = vector.load %arg7[%c0_24, %c0_25, %c0_26] : memref<1x1x128xf32, #tpu.memory_space<vmem>>, vector<1x1x128xf32>
    tpu.vector_store %arg7[%c0_24, %c0_25, %c0_26], %21 {strides = array<i32>} : memref<1x1x128xf32, #tpu.memory_space<vmem>>, vector<1x1x128xf32>,
    return
  }
  func.func @transform_0(%arg0: i32, %arg1: i32, %arg2: i32) -> (i32, i32, i32, i32, i32) {
    %c0_i32 = arith.constant 0 : i32
    %c0_i32_0 = arith.constant 0 : i32
    %c0_i32_1 = arith.constant 0 : i32
    return %arg0, %arg1, %arg2, %c0_i32, %c0_i32_0 : i32, i32, i32, i32, i32
  }
  func.func @transform_1(%arg0: i32, %arg1: i32, %arg2: i32) -> (i32, i32) {
    %c0_i32 = arith.constant 0 : i32
    %c0_i32_0 = arith.constant 0 : i32
    %c0_i32_1 = arith.constant 0 : i32
    return %c0_i32, %c0_i32_0 : i32, i32
  }
  func.func @transform_2(%arg0: i32, %arg1: i32, %arg2: i32) -> (i32, i32, i32, i32, i32) {
    %c0_i32 = arith.constant 0 : i32
    %c0_i32_0 = arith.constant 0 : i32
    %c0_i32_1 = arith.constant 0 : i32
    return %arg0, %arg1, %arg2, %c0_i32, %c0_i32_0 : i32, i32, i32, i32, i32
  }
  func.func @transform_3(%arg0: i32, %arg1: i32, %arg2: i32) -> (i32, i32, i32) {
    %c0_i32 = arith.constant 0 : i32
    %c0_i32_0 = arith.constant 0 : i32
    %c0_i32_1 = arith.constant 0 : i32
    return %arg0, %c0_i32, %c0_i32_0 : i32, i32, i32
  }
  func.func @transform_4(%arg0: i32, %arg1: i32, %arg2: i32) -> (i32, i32, i32) {
    %c0_i32 = arith.constant 0 : i32
    %c0_i32_0 = arith.constant 0 : i32
    %c0_i32_1 = arith.constant 0 : i32
    return %arg0, %c0_i32, %c0_i32_0 : i32, i32, i32
  }
}

</mosaic_0001>

<bundles_post_ra>
// kernel: conv3d_bn.1
= control target key start
LH: loop header
LB: loop body
LE: loop exit
PB: predicated region body
PF: predicated region fallthrough
CT: control target
= control target key end

     0   :  { %s868_s15 = smov 0   ;;  %s870_s16 = smov 0   ;;  %s976_s0 = inlined_call_operand.vmem [shape: bf16[2,4,8,8,128], index: 0, kind: input, shape index: {}]   ;;  %s977_s1 = inlined_call_operand.vmem [shape: bf16[128,128], index: 1, kind: input, shape index: {}]   ;;  %s978_s2 = inlined_call_operand.vmem [shape: bf16[2,4,8,8,128], index: 2, kind: output, shape index: {0}]   ;;  %s979_s3 = inlined_call_operand.vmem [shape: f32[2,1,128], index: 3, kind: output, shape index: {1}]   ;;  %s980_s4 = inlined_call_operand.vmem [shape: f32[2,1,128], index: 4, kind: output, shape index: {2}]  }
   0x1   :  { %s872_s17 = smov 0   ;;  %s874_s18 = smov 0  }
   0x2   :  { %s876_s19 = smov 0  }
   0x3 LB: > { %s30_s20 = sadd.s32 1, %s832_s17  ;;  %s34_s21 = sadd.s32 1, %s836_s18  ;;  %s840_s19 = sphi %s876_s19, %s15_s19   ;;  %s836_s18 = sphi %s874_s18, %s984_s18   ;;  %s832_s17 = sphi %s872_s17, %s983_s17   ;;  %s828_s16 = sphi %s870_s16, %s982_s16   ;;  %s824_s15 = sphi %s868_s15, %s981_s15  }
   0x4   : > { %p32_p0 = scmp.ge.s32.totalorder %s30_s20, 4  ;;  %p643_p1 = scmp.ge.s32.totalorder %s840_s19, 1 }
   0x5   : > { %p203_p2 = scmp.lt.s32.totalorder %s840_s19, 9 }
   0x6   : > { %s986_s20 = smov (%p32_p0, %s30_s20), 0  ;;  %s988_s21 = smov (!%p32_p0, %s34_s21), %s836_s18 }
   0x7   : > { %p204_p3 = pnand %p643_p1, %p203_p2  ;;  %p36_p4 = scmp.ge.s32.totalorder %s988_s21, 2 }
   0x8   : > { %p252_p5 = scmp.lt.s32.totalorder (!%p204_p3), %s828_s16, 1  ;;  %p254_p6 = scmp.lt.s32.totalorder (!%p204_p3), %s824_s15, 3 }
   0x9   : > { %s990_s21 = smov (%p36_p4, %s988_s21), 0  ;;  %207 = sbr.rel (%p204_p3) target bundleno = 219 (0xdb), region = 28 }
   0xa   : > { %p285_p7 = scmp.eq.s32.totalorder (!%p204_p3), %s824_s15, 0 }
   0xe   : > { %s992_s16 = smov (!%p252_p5, %s828_s16), 1  ;;  %s994_s15 = smov (!%p254_p6, %s824_s15), 3  ;;  %v842_v0 = vmov (%p285_p7), 0.0  }
   0xf   : > { %s645_s22 = sshll.u32 %s992_s16, 5  ;;  %s906_s25 = scalar_lea.vmem %s979_s3, %s992_s16 }
  0x10   : > { %s644_s26 = sshll.u32 %s994_s15, 3  ;;  %s911_s29 = scalar_lea.vmem %s980_s4, %s992_s16  ;;  %291 = vst [vmem:[%s906_s25] sm:$0x1] (%p285_p7), %v842_v0 }
  0x11   : > { %s261_s30 = sadd.s32 %s645_s22, %s644_s26  ;;  %290 = sbr.rel (!%p285_p7) target bundleno = 22 (0x16), region = 32  ;;  %292 = vst [vmem:[%s911_s29] sm:$0x1] (%p285_p7), %v842_v0 }
  0x12   : > { %s646_s5 = sshll.u32 %s261_s30, 2 }
  0x13   : > { %s916_s8 = scalar_lea.vmem %s976_s0, %s646_s5  ;;  %s921_s11 = scalar_lea.vmem %s978_s2, %s646_s5 }
  0x16 PF: > { %v713_v1 = vld [vmem:[%s977_s1 + $0x38] sm:$0xff]  ;;  %v712_v2 = vld [vmem:[%s977_s1 + $0x30] sm:$0xff]  ;;  %v711_v3 = vld [vmem:[%s977_s1 + $0x28] sm:$0xff] }
  0x17   : > { %389 = vmatpush.bf16.msra.mxu0 %v713_v1  ;;  %737 = vmatpush.bf16.msra.mxu1 %v713_v1  ;;  %v710_v4 = vld [vmem:[%s977_s1 + $0x20] sm:$0xff]  ;;  %v709_v5 = vld [vmem:[%s977_s1 + $0x18] sm:$0xff]  ;;  %v708_v6 = vld [vmem:[%s977_s1 + $0x10] sm:$0xff] }
  0x18   : > { %738 = vmatpush.bf16.msra.mxu2 %v713_v1  ;;  %739 = vmatpush.bf16.msra.mxu3 %v713_v1  ;;  %v707_v7 = vld [vmem:[%s977_s1 + $0x8] sm:$0xff]  ;;  %v706_v8 = vld [vmem:[%s977_s1] sm:$0xff]  ;;  %v704_v11 = vld [vmem:[%s916_s8 + $0x10] sm:$0xff] }
  0x19   : > { %v702_v9 = vld [vmem:[%s916_s8] sm:$0xff]  ;;  %v703_v10 = vld [vmem:[%s916_s8 + $0x8] sm:$0xff]  ;;  %v705_v12 = vld [vmem:[%s916_s8 + $0x18] sm:$0xff] }
  0x1a   : > { %v434_v56 = vld [vmem:[%s906_s25] sm:$0x1] }
  0x1b   : > { %390 = vmatpush.bf16.msra.mxu0 %v712_v2  ;;  %740 = vmatpush.bf16.msra.mxu1 %v712_v2  ;;  %v450_v59 = vld [vmem:[%s911_s29] sm:$0x1] }
  0x1c   : > { %741 = vmatpush.bf16.msra.mxu2 %v712_v2  ;;  %742 = vmatpush.bf16.msra.mxu3 %v712_v2 }
  0x1f   : > { %391 = vmatpush.bf16.msra.mxu0 %v711_v3  ;;  %743 = vmatpush.bf16.msra.mxu1 %v711_v3 }
  0x20   : > { %744 = vmatpush.bf16.msra.mxu2 %v711_v3  ;;  %745 = vmatpush.bf16.msra.mxu3 %v711_v3 }
  0x23   : > { %392 = vmatpush.bf16.msra.mxu0 %v710_v4  ;;  %746 = vmatpush.bf16.msra.mxu1 %v710_v4 }
  0x24   : > { %747 = vmatpush.bf16.msra.mxu2 %v710_v4  ;;  %748 = vmatpush.bf16.msra.mxu3 %v710_v4 }
  0x27   : > { %393 = vmatpush.bf16.msra.mxu0 %v709_v5  ;;  %749 = vmatpush.bf16.msra.mxu1 %v709_v5 }
  0x28   : > { %750 = vmatpush.bf16.msra.mxu2 %v709_v5  ;;  %751 = vmatpush.bf16.msra.mxu3 %v709_v5 }
  0x2b   : > { %394 = vmatpush.bf16.msra.mxu0 %v708_v6  ;;  %752 = vmatpush.bf16.msra.mxu1 %v708_v6 }
  0x2c   : > { %753 = vmatpush.bf16.msra.mxu2 %v708_v6  ;;  %754 = vmatpush.bf16.msra.mxu3 %v708_v6 }
  0x2f   : > { %395 = vmatpush.bf16.msra.mxu0 %v707_v7  ;;  %755 = vmatpush.bf16.msra.mxu1 %v707_v7 }
  0x30   : > { %756 = vmatpush.bf16.msra.mxu2 %v707_v7  ;;  %757 = vmatpush.bf16.msra.mxu3 %v707_v7 }
  0x33   : > { %396 = vmatpush.bf16.msra.mxu0 %v706_v8  ;;  %758 = vmatpush.bf16.msra.mxu1 %v706_v8 }
  0x34   : > { %759 = vmatpush.bf16.msra.mxu2 %v706_v8  ;;  %760 = vmatpush.bf16.msra.mxu3 %v706_v8 }
  0x36   : > { %397 = vmatmul.bf16.vlgmr.msra.gmra.mxu0 %v702_v9  ;;  %402 = vmatmul.bf16.vlgmr.msra.gmra.mxu1 %v703_v10 }
  0x37   : > { %407 = vmatmul.bf16.vlgmr.msra.gmra.mxu2 %v704_v11  ;;  %412 = vmatmul.bf16.vlgmr.msra.gmra.mxu3 %v705_v12 }
  0xb3   : > { %v398_v13 = vpop.f32.mrf.mxu0  ;;  %v403_v14 = vpop.f32.mrf.mxu1 }
  0xb4   : > { %v451_v17 = vmul.f32 %v398_v13, %v398_v13  ;;  %v453_v24 = vmul.f32 %v403_v14, %v403_v14 }
  0xba   : > { %v408_v15 = vpop.f32.mrf.mxu2  ;;  %v413_v16 = vpop.f32.mrf.mxu3 }
  0xbb   : > { %v400_v18 = vpop.f32.mrf.mxu0  ;;  %v405_v19 = vpop.f32.mrf.mxu1  ;;  %v455_v30 = vmul.f32 %v408_v15, %v408_v15  ;;  %v457_v40 = vmul.f32 %v413_v16, %v413_v16 }
  0xbc   : > { %v717_v20 = vpack.c.bf16 %v400_v18, %v398_v13  ;;  %v435_v21 = vadd.f32 %v400_v18, %v398_v13  ;;  %v452_v22 = vmul.f32 %v400_v18, %v400_v18  ;;  %v722_v23 = vpack.c.bf16 %v405_v19, %v403_v14 }
  0xbd   : > { %v454_v28 = vmul.f32 %v405_v19, %v405_v19 }
  0xbe   : > { %718 = vst [vmem:[%s921_s11] sm:$0xff] %v717_v20   ;;  %v459_v25 = vadd.f32 %v452_v22, %v451_v17  ;;  %v436_v26 = vadd.f32 %v435_v21, %v403_v14 }
  0xbf   : > { %734 = vst [vmem:[%s921_s11 + $0x8] sm:$0xff] %v722_v23  }
  0xc0   : > { %v437_v27 = vadd.f32 %v436_v26, %v405_v19  ;;  %v460_v29 = vadd.f32 %v459_v25, %v453_v24 }
  0xc2   : > { %v461_v31 = vadd.f32 %v460_v29, %v454_v28  ;;  %v410_v32 = vpop.f32.mrf.mxu2  ;;  %v438_v33 = vadd.f32 %v437_v27, %v408_v15  ;;  %v415_v34 = vpop.f32.mrf.mxu3 }
  0xc3   : > { %v727_v35 = vpack.c.bf16 %v410_v32, %v408_v15  ;;  %v732_v36 = vpack.c.bf16 %v415_v34, %v413_v16  ;;  %v456_v38 = vmul.f32 %v410_v32, %v410_v32  ;;  %v458_v44 = vmul.f32 %v415_v34, %v415_v34 }
  0xc4   : > { %v439_v37 = vadd.f32 %v438_v33, %v410_v32  ;;  %v462_v39 = vadd.f32 %v461_v31, %v455_v30 }
  0xc5   : > { %735 = vst [vmem:[%s921_s11 + $0x10] sm:$0xff] %v727_v35  }
  0xc6   : > { %v463_v41 = vadd.f32 %v462_v39, %v456_v38  ;;  %736 = vst [vmem:[%s921_s11 + $0x18] sm:$0xff] %v732_v36   ;;  %v440_v42 = vadd.f32 %v439_v37, %v413_v16 }
  0xc8   : > { %v441_v43 = vadd.f32 %v440_v42, %v415_v34  ;;  %v464_v45 = vadd.f32 %v463_v41, %v457_v40 }
  0xca   : > { %v442_v46 = vrot.slane %v441_v43, 4  ;;  %v465_v47 = vadd.f32 %v464_v45, %v458_v44 }
  0xcc   : > { %v443_v48 = vadd.f32 %v442_v46, %v441_v43  ;;  %v466_v49 = vrot.slane %v465_v47, 4 }
  0xce   : > { %v444_v50 = vrot.slane %v443_v48, 2  ;;  %v467_v51 = vadd.f32 %v466_v49, %v465_v47 }
  0xd0   : > { %v445_v52 = vadd.f32 %v444_v50, %v443_v48  ;;  %v468_v53 = vrot.slane %v467_v51, 2 }
  0xd2   : > { %v446_v54 = vrot.slane %v445_v52, 1  ;;  %v469_v55 = vadd.f32 %v468_v53, %v467_v51 }
  0xd4   : > { %v447_v57 = vadd.f32 %v446_v54, %v445_v52  ;;  %v470_v58 = vrot.slane %v469_v55, 1 }
  0xd6   : > { %v448_v60 = vadd.f32 %v447_v57, %v434_v56  ;;  %v471_v61 = vadd.f32 %v470_v58, %v469_v55 }
  0xd8   : > { %449 = vst [vmem:[%s906_s25] sm:$0x1] %v448_v60  ;;  %v472_v62 = vadd.f32 %v471_v61, %v450_v59 }
  0xda   : > { %473 = vst [vmem:[%s911_s29] sm:$0x1] %v472_v62 }
  0xdb PF: > { %s15_s19 = sadd.s32 1, %s840_s19   ;;  %s981_s15 = smov %s832_s17 }
  0xdc   : > { %p12_p8 = scmp.ge.s32.totalorder %s15_s19, 10   ;;  %s982_s16 = smov %s836_s18 }
  0xdd   : > { %s983_s17 = smov %s986_s20  ;;  %s984_s18 = smov %s990_s21 }
  0xde   :  { %14 = sbr.rel (!%p12_p8) target bundleno = 3 (0x3), region = 86 }

</bundles_post_ra>
